<compile_context>
chip_gen: v6e
topology: v6e:2x2x1
jax: 0.10.0
libtpu: 0.0.40
codegen_flags: <defaults>
</compile_context>

<pallas_src>
import functools

import jax
import jax.numpy as jnp
from jax.experimental import pallas as pl
from jax.experimental.pallas import tpu as pltpu


_LANE = 128
_ROW_ALIGN = 1024                 # tile granularity: 8 sublanes x 128 lanes
_REAL_TILE_BYTES = 4 << 20        # target >= 4 MiB of real x_b per grid step
_TILE_VMEM_BUDGET = 10 << 20      # double-buffered block buffers per pass
_FUSED_VMEM_BUDGET = 12 << 20     # threshold for the single-pass fast path
_MAX_VMEM_LIMIT = 32 << 20


def _cdiv(a, b):
    return -(-a // b)


def _round_up(x, m):
    return _cdiv(x, m) * m


def _vmem_limit(block_bytes):
    # Block buffers + generous headroom for compiler-managed intermediates.
    return int(min(max(int(block_bytes * 2.5) + (2 << 20), 8 << 20), _MAX_VMEM_LIMIT))


def _sum_all(x):
    # (R, 128) -> (1, 1): lane reduce then sublane reduce (keepdims throughout).
    return jnp.sum(jnp.sum(x, axis=1, keepdims=True), axis=0, keepdims=True)


# ----------------------------------------------------------------------------
# Pass 1: per-batch masked statistics, lane-wide accumulators.
# ----------------------------------------------------------------------------
def _stats_kernel(xa_ref, xb_ref, fsum_ref, tsum_ref, fcnt_ref):
    @pl.when(pl.program_id(2) == 0)
    def _init():
        fsum_ref[...] = jnp.zeros_like(fsum_ref)
        tsum_ref[...] = jnp.zeros_like(tsum_ref)
        fcnt_ref[...] = jnp.zeros_like(fcnt_ref)

    c = xb_ref.shape[0]
    mask = (xa_ref[...] > 0.5).astype(jnp.float32)            # (rt, 128)
    # Sublane reduce only -> lane-wide partials; the 128->1 cross-lane reduce
    # is deferred to the tiny JAX epilogue.
    fcnt_ref[...] += jnp.sum(mask, axis=0, keepdims=True)     # (1, 128)

    f_rows, t_rows = [], []
    for ch in range(c):                                        # static unroll
        row = xb_ref[ch].astype(jnp.float32)                   # (rt, 128)
        f_rows.append(jnp.sum(mask * row, axis=0, keepdims=True))
        t_rows.append(jnp.sum(row, axis=0, keepdims=True))
    fsum_ref[...] += jnp.concatenate(f_rows, axis=0)           # (c, 128)
    tsum_ref[...] += jnp.concatenate(t_rows, axis=0)           # (c, 128)


# ----------------------------------------------------------------------------
# Pass 2: per-voxel L2 distances to the two means + softmax (sigmoid form).
# ----------------------------------------------------------------------------
def _dist_kernel(fmean_ref, bmean_ref, xb_ref, o_ref):
    c = xb_ref.shape[0]
    fmean = fmean_ref[...]                                     # (c, 1, 1)
    bmean = bmean_ref[...]                                     # (c, 1, 1)
    f_acc = jnp.zeros(o_ref.shape, jnp.float32)                # (rt, 128)
    b_acc = jnp.zeros(o_ref.shape, jnp.float32)
    # Static channel unroll: each row is loaded once and reused for both
    # distances; pure VPU adds (no cross-lane work).
    # TODO(synk): on v7x the mean dot-products could be offloaded to the idle
    # MXU (d^2 = sum x^2 - 2 m.x + sum m^2); kept on the VPU for portability.
    for ch in range(c):
        row = xb_ref[ch].astype(jnp.float32)                   # (rt, 128)
        df = row - fmean[ch]
        db = row - bmean[ch]
        f_acc = f_acc + df * df
        b_acc = b_acc + db * db
    fore_d = jnp.sqrt(f_acc)
    bkg_d = jnp.sqrt(b_acc)
    # exp(-fd)/(exp(-fd)+exp(-bd)) == sigmoid(bd - fd) == 0.5*(tanh((bd-fd)/2)+1)
    # tanh goes through the EUP slot; avoids the multi-op f32 divide.
    # TODO(synk): torch's `assert torch.exp(-d) != 0` has no kernel equivalent.
    o_ref[...] = 0.5 * (jnp.tanh(0.5 * (bkg_d - fore_d)) + 1.0)


# ----------------------------------------------------------------------------
# Fused single-pass fast path: whole per-batch slab resident in VMEM.
# ----------------------------------------------------------------------------
def _fused_kernel(xa_ref, xb_ref, o_ref, *, n_real):
    c = xb_ref.shape[0]
    mask = (xa_ref[...] > 0.5).astype(jnp.float32)             # (R, 128)
    fcnt = _sum_all(mask)                                      # (1, 1)
    bcnt = jnp.float32(n_real) - fcnt                          # padding excluded
    f_acc = jnp.zeros(o_ref.shape, jnp.float32)
    b_acc = jnp.zeros(o_ref.shape, jnp.float32)
    for ch in range(c):                                        # static unroll
        row = xb_ref[ch].astype(jnp.float32)                   # (R, 128)
        fsum = _sum_all(mask * row)
        tsum = _sum_all(row)
        fmean = fsum / fcnt            # NaN/Inf for all-bkg/all-fore (as torch)
        bmean = (tsum - fsum) / bcnt
        df = row - fmean
        db = row - bmean
        f_acc = f_acc + df * df
        b_acc = b_acc + db * db
    o_ref[...] = 0.5 * (jnp.tanh(0.5 * (jnp.sqrt(b_acc) - jnp.sqrt(f_acc))) + 1.0)


# ----------------------------------------------------------------------------
# Wrappers.
# ----------------------------------------------------------------------------
def _pad_and_fold(x_a, x_b, n, n_pad):
    """Flatten spatial dims, zero-pad N to n_pad and fold to (rows, 128)."""
    b, c = x_b.shape[0], x_b.shape[1]
    xa = jnp.reshape(x_a, (b, 1, n))
    xb = jnp.reshape(x_b, (b, c, n))
    if n_pad != n:
        # Zero padding is stats-neutral: padded mask (0 <= 0.5) is never
        # foreground, padded x_b adds 0 to the sums, and bkg_cnt uses real N.
        pad = ((0, 0), (0, 0), (0, n_pad - n))
        xa = jnp.pad(xa, pad)
        xb = jnp.pad(xb, pad)
    rows = n_pad // _LANE
    return (jnp.reshape(xa, (b, 1, rows, _LANE)),
            jnp.reshape(xb, (b, c, rows, _LANE)))


def _nn_forward_fused(x_a, x_b):
    b, c, d, h, w = x_b.shape
    n = d * h * w
    n_pad = _round_up(n, _ROW_ALIGN)
    rows = n_pad // _LANE
    xa4, xb4 = _pad_and_fold(x_a, x_b, n, n_pad)
    ia = jnp.dtype(x_a.dtype).itemsize
    ib = jnp.dtype(x_b.dtype).itemsize
    block_bytes = 2 * n_pad * (ia + c * ib + 4)     # double-buffered over batch

    out = pl.pallas_call(
        functools.partial(_fused_kernel, n_real=float(n)),
        out_shape=jax.ShapeDtypeStruct((b, 1, rows, _LANE), jnp.float32),
        grid_spec=pltpu.PrefetchScalarGridSpec(
            num_scalar_prefetch=0,
            grid=(b,),
            in_specs=[
                pl.BlockSpec((None, None, rows, _LANE), lambda i: (i, 0, 0, 0)),
                pl.BlockSpec((None, c, rows, _LANE), lambda i: (i, 0, 0, 0)),
            ],
            out_specs=pl.BlockSpec((None, None, rows, _LANE),
                                   lambda i: (i, 0, 0, 0)),
        ),
        compiler_params=pltpu.CompilerParams(
            dimension_semantics=("parallel",),
            vmem_limit_bytes=_vmem_limit(block_bytes)),
    )(xa4, xb4)

    out = jnp.reshape(out, (b, 1, n_pad))[:, :, :n]
    return jnp.reshape(out, (b, 1, d, h, w))


def _nn_forward_two_pass(x_a, x_b, tile_elems=None):
    b, c, d, h, w = x_b.shape
    n = d * h * w
    ia = jnp.dtype(x_a.dtype).itemsize
    ib = jnp.dtype(x_b.dtype).itemsize

    # Tile sizing: >= _REAL_TILE_BYTES of real x_b per grid step (amortise the
    # ~0.35us fixed step cost), capped by the double-buffered VMEM budget of
    # the heavier pass; rounded to 8 sublanes x 128 lanes.
    bytes_per_voxel = 2 * max(ia + c * ib, c * ib + 4)
    tile_cap = max(_ROW_ALIGN,
                   _REAL_TILE_BYTES // max(c * ib, 1) // _ROW_ALIGN * _ROW_ALIGN)
    tile_cap = min(tile_cap,
                   max(_ROW_ALIGN,
                       _TILE_VMEM_BUDGET // bytes_per_voxel // _ROW_ALIGN * _ROW_ALIGN))
    if tile_elems is not None:                      # testing override
        tile_cap = max(_ROW_ALIGN, _round_up(tile_elems, _ROW_ALIGN))
    # Distribute N as evenly as possible over ceil(N / tile_cap) tiles.
    n_tiles = _cdiv(n, tile_cap)
    tile_n = _round_up(_cdiv(n, n_tiles), _ROW_ALIGN)
    n_tiles = _cdiv(n, tile_n)
    # v7x megacore: give the pass-1 reduction a second parallel axis so both
    # TensorCores work even at b=1..2 (no effect on single-TC v5e/v6e).
    if n_tiles >= 2:
        n_split = 2
        tiles_per_split = _cdiv(n_tiles, 2)
        n_tiles = 2 * tiles_per_split
    else:
        n_split, tiles_per_split = 1, n_tiles
    n_pad = n_tiles * tile_n
    rows_t = tile_n // _LANE

    xa4, xb4 = _pad_and_fold(x_a, x_b, n, n_pad)

    # ---- pass 1: per-batch masked statistics (tiled reduction over N) ------
    pass1_blocks = 2 * tile_n * (ia + c * ib) + 2 * (2 * c + 1) * _LANE * 4
    fsum, tsum, fcnt = pl.pallas_call(
        _stats_kernel,
        out_shape=(
            jax.ShapeDtypeStruct((b, n_split, c, _LANE), jnp.float32),
            jax.ShapeDtypeStruct((b, n_split, c, _LANE), jnp.float32),
            jax.ShapeDtypeStruct((b, n_split, 1, _LANE), jnp.float32),
        ),
        grid_spec=pltpu.PrefetchScalarGridSpec(
            num_scalar_prefetch=0,
            grid=(b, n_split, tiles_per_split),
            in_specs=[
                pl.BlockSpec((None, None, rows_t, _LANE),
                             lambda i, s, t: (i, 0, s * tiles_per_split + t, 0)),
                pl.BlockSpec((None, c, rows_t, _LANE),
                             lambda i, s, t: (i, 0, s * tiles_per_split + t, 0)),
            ],
            out_specs=[
                pl.BlockSpec((None, None, c, _LANE), lambda i, s, t: (i, s, 0, 0)),
                pl.BlockSpec((None, None, c, _LANE), lambda i, s, t: (i, s, 0, 0)),
                pl.BlockSpec((None, None, 1, _LANE), lambda i, s, t: (i, s, 0, 0)),
            ],
        ),
        compiler_params=pltpu.CompilerParams(
            dimension_semantics=("parallel", "parallel", "arbitrary"),
            vmem_limit_bytes=_vmem_limit(pass1_blocks)),
    )(xa4, xb4)

    # Tiny JAX epilogue: finish the lane/split reduction, derive both means.
    fore_sum = jnp.sum(fsum, axis=(1, 3))                       # (b, c)
    total_sum = jnp.sum(tsum, axis=(1, 3))                      # (b, c)
    fore_cnt = jnp.sum(fcnt, axis=(1, 3))                       # (b, 1)
    fore_mean = fore_sum / fore_cnt            # NaN/Inf if all-bkg, as in torch
    bkg_mean = (total_sum - fore_sum) / (jnp.float32(n) - fore_cnt)
    fore_mean = jnp.reshape(fore_mean, (b, c, 1, 1)).astype(jnp.float32)
    bkg_mean = jnp.reshape(bkg_mean, (b, c, 1, 1)).astype(jnp.float32)

    # ---- pass 2: distances + softmax, tiled over N --------------------------
    # Means use a constant block index -> fetched once per batch by the
    # pipeline (not per n-tile).
    pass2_blocks = 2 * tile_n * (c * ib + 4) + 4 * c * 8 * _LANE * 4
    out = pl.pallas_call(
        _dist_kernel,
        out_shape=jax.ShapeDtypeStruct((b, 1, n_pad // _LANE, _LANE), jnp.float32),
        grid_spec=pltpu.PrefetchScalarGridSpec(
            num_scalar_prefetch=0,
            grid=(b, n_tiles),
            in_specs=[
                pl.BlockSpec((None, c, 1, 1), lambda i, t: (i, 0, 0, 0)),
                pl.BlockSpec((None, c, 1, 1), lambda i, t: (i, 0, 0, 0)),
                pl.BlockSpec((None, c, rows_t, _LANE), lambda i, t: (i, 0, t, 0)),
            ],
            out_specs=pl.BlockSpec((None, None, rows_t, _LANE),
                                   lambda i, t: (i, 0, t, 0)),
        ),
        compiler_params=pltpu.CompilerParams(
            # both axes independent -> v7x can shard tiles across its 2 TCs
            dimension_semantics=("parallel", "parallel"),
            vmem_limit_bytes=_vmem_limit(pass2_blocks)),
    )(fore_mean, bkg_mean, xb4)

    out = jnp.reshape(out, (b, 1, n_pad))[:, :, :n]
    return jnp.reshape(out, (b, 1, d, h, w))


def nn_forward(x_a, x_b, *, force_two_pass=False, tile_elems=None):
    """x_a: (b,1,d,h,w), x_b: (b,c,d,h,w) -> fore_p: (b,1,d,h,w) float32."""
    b, c, d, h, w = x_b.shape
    assert x_a.shape == (b, 1, d, h, w)
    n = d * h * w
    ia = jnp.dtype(x_a.dtype).itemsize
    ib = jnp.dtype(x_b.dtype).itemsize
    n_pad = _round_up(n, _ROW_ALIGN)
    fused_blocks = 2 * n_pad * (ia + c * ib + 4)
    if (not force_two_pass) and fused_blocks <= _FUSED_VMEM_BUDGET:
        # Single-pass fast path: x_b is read from HBM exactly once.
        return _nn_forward_fused(x_a, x_b)
    return _nn_forward_two_pass(x_a, x_b, tile_elems)


# ----------------------------------------------------------------------------
# Pure-JAX reference mirroring the torch code.
# ----------------------------------------------------------------------------
def _reference(x_a, x_b):
    x_a = (x_a > 0.5).astype(jnp.float32)
    b, c, d, h, w = x_b.shape
    n = d * h * w
    xb = jnp.reshape(x_b, (b, c, n)).astype(jnp.float32)
    xa = jnp.reshape(x_a, (b, 1, n))
    fore_ac = jnp.sum(xa * xb, axis=2) / jnp.sum(xa, axis=2)
    bkg_ac = jnp.sum((1 - xa) * xb, axis=2) / jnp.sum(1 - xa, axis=2)
    fore_ac = fore_ac[:, :, None]
    bkg_ac = bkg_ac[:, :, None]
    fore_d = jnp.linalg.norm(xb - fore_ac, ord=2, axis=1).reshape(b, 1, d, h, w)
    bkg_d = jnp.linalg.norm(xb - bkg_ac, ord=2, axis=1).reshape(b, 1, d, h, w)
    return jnp.exp(-fore_d) / (jnp.exp(-fore_d) + jnp.exp(-bkg_d))


if __name__ == "__main__":
    key = jax.random.PRNGKey(0)
    k1, k2, k3, k4, k5, k6 = jax.random.split(key, 6)
    ok = True

    def _check(x_a, x_b, **kw):
        got = nn_forward(x_a, x_b, **kw)
        jax.block_until_ready(got)
        ref = _reference(x_a, x_b)
        assert got.shape == ref.shape
        assert jnp.allclose(got, ref, atol=1e-5, rtol=1e-5)

    # Case 1: lane-aligned volume (N = 256) - fused path and forced two-pass.
    b, c, d, h, w = 2, 4, 4, 8, 8
    x_a = jax.random.uniform(k1, (b, 1, d, h, w), dtype=jnp.float32)
    x_b = jax.random.normal(k2, (b, c, d, h, w), dtype=jnp.float32)
    _check(x_a, x_b)
    _check(x_a, x_b, force_two_pass=True)

    # Case 2: ragged N (105) to exercise the lane-padding path.
    d2, h2, w2 = 3, 5, 7
    x_a2 = jax.random.uniform(k3, (b, 1, d2, h2, w2), dtype=jnp.float32)
    x_b2 = jax.random.normal(k4, (b, c, d2, h2, w2), dtype=jnp.float32)
    _check(x_a2, x_b2)
    _check(x_a2, x_b2, force_two_pass=True)

    # Case 3: multi-tile two-pass path (small tiles forced) to exercise the
    # cross-tile accumulation and the split reduction axis.
    d3, h3, w3 = 8, 16, 32   # N = 4096
    x_a3 = jax.random.uniform(k5, (b, 1, d3, h3, w3), dtype=jnp.float32)
    x_b3 = jax.random.normal(k6, (b, c, d3, h3, w3), dtype=jnp.float32)
    _check(x_a3, x_b3, force_two_pass=True, tile_elems=1024)

    print("KERNEL_OK")
</pallas_src>

<mosaic_0001>
module attributes {stable_mosaic.version = 11 : i64} {
  func.func @_fused_kernel(%arg0: i32, %arg1: memref<1x1x8x128xf32, #tpu.memory_space<vmem>>, %arg2: memref<1x4x8x128xf32, #tpu.memory_space<vmem>>, %arg3: memref<1x1x8x128xf32, #tpu.memory_space<vmem>>) attributes {dimension_semantics = [#tpu.dimension_semantics<parallel>], iteration_bounds = array<i64: 2>, scalar_prefetch = 0 : i64, scratch_operands = 0 : i64, tpu.core_type = #tpu.core_type<tc>, window_params = [{transform_indices = @transform_0, window_bounds = array<i64: 1, 1, 8, 128>}, {transform_indices = @transform_1, window_bounds = array<i64: 1, 4, 8, 128>}, {transform_indices = @transform_2, window_bounds = array<i64: 1, 1, 8, 128>}]} {
    %c0 = arith.constant 0 : index
    %c0_0 = arith.constant 0 : index
    %c0_1 = arith.constant 0 : index
    %c0_2 = arith.constant 0 : index
    %0 = vector.load %arg1[%c0, %c0_0, %c0_1, %c0_2] : memref<1x1x8x128xf32, #tpu.memory_space<vmem>>, vector<1x1x8x128xf32>
    %1 = vector.shape_cast %0 : vector<1x1x8x128xf32> to vector<8x128xf32>
    %cst = arith.constant 5.000000e-01 : f32
    %2 = vector.broadcast %cst : f32 to vector<8x128xf32>
    %3 = arith.cmpf ogt, %1, %2 : vector<8x128xf32>
    %4 = arith.extui %3 : vector<8x128xi1> to vector<8x128xi32>
    %5 = arith.sitofp %4 : vector<8x128xi32> to vector<8x128xf32>
    %cst_3 = arith.constant dense<0.000000e+00> : vector<8xf32>
    %6 = vector.multi_reduction <add>, %5, %cst_3 [1] : vector<8x128xf32> to vector<8xf32>
    %7 = vector.shape_cast %6 : vector<8xf32> to vector<8x1xf32>
    %cst_4 = arith.constant dense<0.000000e+00> : vector<1xf32>
    %8 = vector.multi_reduction <add>, %7, %cst_4 [0] : vector<8x1xf32> to vector<1xf32>
    %9 = vector.shape_cast %8 : vector<1xf32> to vector<1x1xf32>
    %cst_5 = arith.constant 2.560000e+02 : f32
    %10 = vector.broadcast %cst_5 : f32 to vector<1x1xf32>
    %11 = arith.subf %10, %9 : vector<1x1xf32>
    %cst_6 = arith.constant 0.000000e+00 : f32
    %12 = vector.broadcast %cst_6 : f32 to vector<8x128xf32>
    %cst_7 = arith.constant 0.000000e+00 : f32
    %13 = vector.broadcast %cst_7 : f32 to vector<8x128xf32>
    %c0_8 = arith.constant 0 : index
    %c0_9 = arith.constant 0 : index
    %c0_10 = arith.constant 0 : index
    %c0_11 = arith.constant 0 : index
    %14 = vector.load %arg2[%c0_8, %c0_9, %c0_10, %c0_11] : memref<1x4x8x128xf32, #tpu.memory_space<vmem>>, vector<1x1x8x128xf32>
    %15 = vector.shape_cast %14 : vector<1x1x8x128xf32> to vector<8x128xf32>
    %16 = arith.mulf %5, %15 : vector<8x128xf32>
    %cst_12 = arith.constant dense<0.000000e+00> : vector<8xf32>
    %17 = vector.multi_reduction <add>, %16, %cst_12 [1] : vector<8x128xf32> to vector<8xf32>
    %18 = vector.shape_cast %17 : vector<8xf32> to vector<8x1xf32>
    %cst_13 = arith.constant dense<0.000000e+00> : vector<1xf32>
    %19 = vector.multi_reduction <add>, %18, %cst_13 [0] : vector<8x1xf32> to vector<1xf32>
    %20 = vector.shape_cast %19 : vector<1xf32> to vector<1x1xf32>
    %cst_14 = arith.constant dense<0.000000e+00> : vector<8xf32>
    %21 = vector.multi_reduction <add>, %15, %cst_14 [1] : vector<8x128xf32> to vector<8xf32>
    %22 = vector.shape_cast %21 : vector<8xf32> to vector<8x1xf32>
    %cst_15 = arith.constant dense<0.000000e+00> : vector<1xf32>
    %23 = vector.multi_reduction <add>, %22, %cst_15 [0] : vector<8x1xf32> to vector<1xf32>
    %24 = vector.shape_cast %23 : vector<1xf32> to vector<1x1xf32>
    %25 = arith.divf %20, %9 : vector<1x1xf32>
    %26 = arith.subf %24, %20 : vector<1x1xf32>
    %27 = arith.divf %26, %11 : vector<1x1xf32>
    %28 = vector.broadcast %25 : vector<1x1xf32> to vector<8x128xf32>
    %29 = arith.subf %15, %28 : vector<8x128xf32>
    %30 = vector.broadcast %27 : vector<1x1xf32> to vector<8x128xf32>
    %31 = arith.subf %15, %30 : vector<8x128xf32>
    %32 = arith.mulf %29, %29 : vector<8x128xf32>
    %33 = arith.addf %12, %32 : vector<8x128xf32>
    %34 = arith.mulf %31, %31 : vector<8x128xf32>
    %35 = arith.addf %13, %34 : vector<8x128xf32>
    %c0_16 = arith.constant 0 : index
    %c1 = arith.constant 1 : index
    %c0_17 = arith.constant 0 : index
    %c0_18 = arith.constant 0 : index
    %36 = vector.load %arg2[%c0_16, %c1, %c0_17, %c0_18] : memref<1x4x8x128xf32, #tpu.memory_space<vmem>>, vector<1x1x8x128xf32>
    %37 = vector.shape_cast %36 : vector<1x1x8x128xf32> to vector<8x128xf32>
    %38 = arith.mulf %5, %37 : vector<8x128xf32>
    %cst_19 = arith.constant dense<0.000000e+00> : vector<8xf32>
    %39 = vector.multi_reduction <add>, %38, %cst_19 [1] : vector<8x128xf32> to vector<8xf32>
    %40 = vector.shape_cast %39 : vector<8xf32> to vector<8x1xf32>
    %cst_20 = arith.constant dense<0.000000e+00> : vector<1xf32>
    %41 = vector.multi_reduction <add>, %40, %cst_20 [0] : vector<8x1xf32> to vector<1xf32>
    %42 = vector.shape_cast %41 : vector<1xf32> to vector<1x1xf32>
    %cst_21 = arith.constant dense<0.000000e+00> : vector<8xf32>
    %43 = vector.multi_reduction <add>, %37, %cst_21 [1] : vector<8x128xf32> to vector<8xf32>
    %44 = vector.shape_cast %43 : vector<8xf32> to vector<8x1xf32>
    %cst_22 = arith.constant dense<0.000000e+00> : vector<1xf32>
    %45 = vector.multi_reduction <add>, %44, %cst_22 [0] : vector<8x1xf32> to vector<1xf32>
    %46 = vector.shape_cast %45 : vector<1xf32> to vector<1x1xf32>
    %47 = arith.divf %42, %9 : vector<1x1xf32>
    %48 = arith.subf %46, %42 : vector<1x1xf32>
    %49 = arith.divf %48, %11 : vector<1x1xf32>
    %50 = vector.broadcast %47 : vector<1x1xf32> to vector<8x128xf32>
    %51 = arith.subf %37, %50 : vector<8x128xf32>
    %52 = vector.broadcast %49 : vector<1x1xf32> to vector<8x128xf32>
    %53 = arith.subf %37, %52 : vector<8x128xf32>
    %54 = arith.mulf %51, %51 : vector<8x128xf32>
    %55 = arith.addf %33, %54 : vector<8x128xf32>
    %56 = arith.mulf %53, %53 : vector<8x128xf32>
    %57 = arith.addf %35, %56 : vector<8x128xf32>
    %c0_23 = arith.constant 0 : index
    %c2 = arith.constant 2 : index
    %c0_24 = arith.constant 0 : index
    %c0_25 = arith.constant 0 : index
    %58 = vector.load %arg2[%c0_23, %c2, %c0_24, %c0_25] : memref<1x4x8x128xf32, #tpu.memory_space<vmem>>, vector<1x1x8x128xf32>
    %59 = vector.shape_cast %58 : vector<1x1x8x128xf32> to vector<8x128xf32>
    %60 = arith.mulf %5, %59 : vector<8x128xf32>
    %cst_26 = arith.constant dense<0.000000e+00> : vector<8xf32>
    %61 = vector.multi_reduction <add>, %60, %cst_26 [1] : vector<8x128xf32> to vector<8xf32>
    %62 = vector.shape_cast %61 : vector<8xf32> to vector<8x1xf32>
    %cst_27 = arith.constant dense<0.000000e+00> : vector<1xf32>
    %63 = vector.multi_reduction <add>, %62, %cst_27 [0] : vector<8x1xf32> to vector<1xf32>
    %64 = vector.shape_cast %63 : vector<1xf32> to vector<1x1xf32>
    %cst_28 = arith.constant dense<0.000000e+00> : vector<8xf32>
    %65 = vector.multi_reduction <add>, %59, %cst_28 [1] : vector<8x128xf32> to vector<8xf32>
    %66 = vector.shape_cast %65 : vector<8xf32> to vector<8x1xf32>
    %cst_29 = arith.constant dense<0.000000e+00> : vector<1xf32>
    %67 = vector.multi_reduction <add>, %66, %cst_29 [0] : vector<8x1xf32> to vector<1xf32>
    %68 = vector.shape_cast %67 : vector<1xf32> to vector<1x1xf32>
    %69 = arith.divf %64, %9 : vector<1x1xf32>
    %70 = arith.subf %68, %64 : vector<1x1xf32>
    %71 = arith.divf %70, %11 : vector<1x1xf32>
    %72 = vector.broadcast %69 : vector<1x1xf32> to vector<8x128xf32>
    %73 = arith.subf %59, %72 : vector<8x128xf32>
    %74 = vector.broadcast %71 : vector<1x1xf32> to vector<8x128xf32>
    %75 = arith.subf %59, %74 : vector<8x128xf32>
    %76 = arith.mulf %73, %73 : vector<8x128xf32>
    %77 = arith.addf %55, %76 : vector<8x128xf32>
    %78 = arith.mulf %75, %75 : vector<8x128xf32>
    %79 = arith.addf %57, %78 : vector<8x128xf32>
    %c0_30 = arith.constant 0 : index
    %c3 = arith.constant 3 : index
    %c0_31 = arith.constant 0 : index
    %c0_32 = arith.constant 0 : index
    %80 = vector.load %arg2[%c0_30, %c3, %c0_31, %c0_32] : memref<1x4x8x128xf32, #tpu.memory_space<vmem>>, vector<1x1x8x128xf32>
    %81 = vector.shape_cast %80 : vector<1x1x8x128xf32> to vector<8x128xf32>
    %82 = arith.mulf %5, %81 : vector<8x128xf32>
    %cst_33 = arith.constant dense<0.000000e+00> : vector<8xf32>
    %83 = vector.multi_reduction <add>, %82, %cst_33 [1] : vector<8x128xf32> to vector<8xf32>
    %84 = vector.shape_cast %83 : vector<8xf32> to vector<8x1xf32>
    %cst_34 = arith.constant dense<0.000000e+00> : vector<1xf32>
    %85 = vector.multi_reduction <add>, %84, %cst_34 [0] : vector<8x1xf32> to vector<1xf32>
    %86 = vector.shape_cast %85 : vector<1xf32> to vector<1x1xf32>
    %cst_35 = arith.constant dense<0.000000e+00> : vector<8xf32>
    %87 = vector.multi_reduction <add>, %81, %cst_35 [1] : vector<8x128xf32> to vector<8xf32>
    %88 = vector.shape_cast %87 : vector<8xf32> to vector<8x1xf32>
    %cst_36 = arith.constant dense<0.000000e+00> : vector<1xf32>
    %89 = vector.multi_reduction <add>, %88, %cst_36 [0] : vector<8x1xf32> to vector<1xf32>
    %90 = vector.shape_cast %89 : vector<1xf32> to vector<1x1xf32>
    %91 = arith.divf %86, %9 : vector<1x1xf32>
    %92 = arith.subf %90, %86 : vector<1x1xf32>
    %93 = arith.divf %92, %11 : vector<1x1xf32>
    %94 = vector.broadcast %91 : vector<1x1xf32> to vector<8x128xf32>
    %95 = arith.subf %81, %94 : vector<8x128xf32>
    %96 = vector.broadcast %93 : vector<1x1xf32> to vector<8x128xf32>
    %97 = arith.subf %81, %96 : vector<8x128xf32>
    %98 = arith.mulf %95, %95 : vector<8x128xf32>
    %99 = arith.addf %77, %98 : vector<8x128xf32>
    %100 = arith.mulf %97, %97 : vector<8x128xf32>
    %101 = arith.addf %79, %100 : vector<8x128xf32>
    %102 = math.sqrt %101 : vector<8x128xf32>
    %103 = math.sqrt %99 : vector<8x128xf32>
    %104 = arith.subf %102, %103 : vector<8x128xf32>
    %cst_37 = arith.constant 5.000000e-01 : f32
    %105 = vector.broadcast %cst_37 : f32 to vector<8x128xf32>
    %106 = arith.mulf %105, %104 : vector<8x128xf32>
    %107 = math.tanh %106 : vector<8x128xf32>
    %cst_38 = arith.constant 1.000000e+00 : f32
    %108 = vector.broadcast %cst_38 : f32 to vector<8x128xf32>
    %109 = arith.addf %107, %108 : vector<8x128xf32>
    %cst_39 = arith.constant 5.000000e-01 : f32
    %110 = vector.broadcast %cst_39 : f32 to vector<8x128xf32>
    %111 = arith.mulf %110, %109 : vector<8x128xf32>
    %c0_40 = arith.constant 0 : index
    %c0_41 = arith.constant 0 : index
    %c0_42 = arith.constant 0 : index
    %c0_43 = arith.constant 0 : index
    %112 = vector.load %arg3[%c0_40, %c0_41, %c0_42, %c0_43] : memref<1x1x8x128xf32, #tpu.memory_space<vmem>>, vector<1x1x8x128xf32>
    %113 = vector.shape_cast %112 : vector<1x1x8x128xf32> to vector<8x128xf32>
    %114 = vector.shape_cast %111 : vector<8x128xf32> to vector<1x1x8x128xf32>
    tpu.vector_store %arg3[%c0_40, %c0_41, %c0_42, %c0_43], %114 {strides = array<i32>} : memref<1x1x8x128xf32, #tpu.memory_space<vmem>>, vector<1x1x8x128xf32>,
    return
  }
  func.func @transform_0(%arg0: i32) -> (i32, i32, i32, i32) {
    %c0_i32 = arith.constant 0 : i32
    %c0_i32_0 = arith.constant 0 : i32
    %c0_i32_1 = arith.constant 0 : i32
    %c0_i32_2 = arith.constant 0 : i32
    return %arg0, %c0_i32, %c0_i32_0, %c0_i32_1 : i32, i32, i32, i32
  }
  func.func @transform_1(%arg0: i32) -> (i32, i32, i32, i32) {
    %c0_i32 = arith.constant 0 : i32
    %c0_i32_0 = arith.constant 0 : i32
    %c0_i32_1 = arith.constant 0 : i32
    %c0_i32_2 = arith.constant 0 : i32
    return %arg0, %c0_i32, %c0_i32_0, %c0_i32_1 : i32, i32, i32, i32
  }
  func.func @transform_2(%arg0: i32) -> (i32, i32, i32, i32) {
    %c0_i32 = arith.constant 0 : i32
    %c0_i32_0 = arith.constant 0 : i32
    %c0_i32_1 = arith.constant 0 : i32
    %c0_i32_2 = arith.constant 0 : i32
    return %arg0, %c0_i32, %c0_i32_0, %c0_i32_1 : i32, i32, i32, i32
  }
}

</mosaic_0001>

<bundles_post_ra>
// kernel: tpu_custom_call.1
= control target key start
LH: loop header
LB: loop body
LE: loop exit
PB: predicated region body
PF: predicated region fallthrough
CT: control target
= control target key end

     0   :  { %7 = vsyncpa [#allocation3], 0  ;;  %s909_s0 = inlined_call_operand.hbm [shape: f32[2,1,8,128], index: 0, kind: input, shape index: {}]   ;;  %s910_s1 = inlined_call_operand.hbm [shape: f32[2,4,8,128], index: 1, kind: input, shape index: {}]   ;;  %s911_s2 = inlined_call_operand.hbm [shape: f32[2,1,8,128], index: 2, kind: output, shape index: {}]  }
   0x1   :  { %9 = vsyncpa [#allocation3 + $0x1], 0 }
   0x2   :  { %10 = vsyncpa [#allocation6], 0 }
   0x3   :  { %12 = vsyncpa [#allocation6 + $0x1], 0 }
   0x4   :  { %13 = vsyncpa [#allocation4], 0 }
   0x5   :  { %15 = vsyncpa [#allocation4 + $0x1], 0  ;;  %s684_s9 = smov 0   ;;  %s686_s10 = smov 0  }
   0x6   :  { %s688_s11 = smov 0   ;;  %s690_s12 = smov 0  }
   0x7 LB: > { %s705_s13 = sadd.s32 4294967295, %s661_s12   ;;  %s452_s14 = sadd.s32 4294967294, %s661_s12   ;;  %s661_s12 = sphi %s690_s12, %s929_s12   ;;  %s657_s11 = sphi %s688_s11, %s928_s11   ;;  %s653_s10 = sphi %s686_s10, %s927_s10   ;;  %s649_s9 = sphi %s684_s9, %s926_s9  }
   0x8   : > { %s709_s15 = sadd.s32 1, %s661_s12   ;;  %s28_s16 = sadd.s32 1, %s657_s11 }
   0x9   : > { %s25_s17 = ssub.s32 %s661_s12, %s709_s15  ;;  %p35_p0 = scmp.ne.s32.totalorder %s657_s11, %s653_s10 }
   0xa   : > { %p26_p1 = scmp.eq.s32.totalorder %s25_s17, 0  ;;  %p36_p2 = scmp.eq.s32.totalorder %s661_s12, 0 }
   0xb   : > { %p41_p3 = scmp.ne.s32.totalorder %s653_s10, %s649_s9  ;;  %p42_p4 = scmp.eq.s32.totalorder %s705_s13, 0 }
   0xc   : > { %s721_s18 = scalar_select %p26_p1, %s657_s11, %s28_s16  }
   0xd   : > { %p723_p5 = por %p36_p2, %p35_p0  ;;  %p727_p6 = por %p42_p4, %p41_p3 }
   0xe   : > { %p91_p7 = scmp.eq.s32.totalorder %s705_s13, 1  ;;  %p97_p8 = scmp.eq.s32.totalorder %s452_s14, 1 }
   0xf   : > { %s915_s20 = scalar_select %p727_p6, 1, 0 }
  0x10   : > { %p490_p10 = scmp.lt.s32.totalorder %s661_s12, 2  ;;  %p734_p11 = por %p91_p7, %p35_p0 }
  0x11   : > { %p738_p12 = por %p97_p8, %p41_p3  ;;  %s743_s23 = sand.u32 1, %s657_s11  }
  0x12   : > { %s916_s21 = scalar_select %p734_p11, 1, 0 }
  0x13   : > { %s917_s22 = scalar_select %p738_p12, 1, 0 }
  0x14   : > { %s456_s24 = sshll.u32 %s661_s12, 7  ;;  %s455_s25 = sshll.u32 %s743_s23, 3 }
  0x15   : > { %s750_s28 = scalar_lea.hbm %s909_s0, %s456_s24  ;;  %s121_s29 = scalar_lea.vmem [#allocation2], %s455_s25 }
  0x16   : > { %s128_s30 = sshll.u32 %s121_s29, 4  ;;  %p754_p13 = pnand %p490_p10, %p723_p5  ;;  %s758_s30 = int_to_ptr.vmem [resolvable:$true] %s128_s30 }
  0x17   : > { %s118_s4 = scalar_lea.sflag [#allocation3], %s743_s23  ;;  %s537_s5 = scalar_lea.hbm %s750_s28, 128 }
  0x18   : > { %p538_p2 = scmp.ne.s32.totalorder %s750_s28, %s537_s5  ;;  %p539_p3 = pneg %p754_p13 }
  0x19   : > { %s542_s8 = scalar_lea.hbm %s909_s0, 256  ;;  %p543_p5 = scmp.lt.s32.totalorder %s750_s28, %s909_s0 }
  0x1a   : > { %p540_p4 = pnand %p539_p3, %p538_p2  ;;  %p544_p8 = scmp.lt.s32.totalorder %s542_s8, %s537_s5 }
  0x1c   : > { %p541_p7 = pneg %p540_p4  ;;  %p545_p10 = por %p544_p8, %p543_p5 }
  0x1e   : > { %p546_p9 = pnand %p545_p10, %p541_p7 }
  0x20   : > { %549 = shalt.err (!%p546_p9)
}
  0x21   : > { %s550_s17 = scalar_lea.vmem %s758_s30, 128  ;;  %s663_s19 = smov [#allocation2]  }
  0x22   : > { %p551_p0 = scmp.ne.s32.totalorder %s758_s30, %s550_s17  ;;  %s555_s24 = sshll.u32 %s663_s19, 4  ;;  %s556_s24 = int_to_ptr.vmem [resolvable:$false] %s555_s24 }
  0x23   : > { %s557_s25 = scalar_lea.vmem %s556_s24, 256  ;;  %p558_p1 = scmp.lt.s32.totalorder %s758_s30, %s556_s24 }
  0x24   : > { %p553_p2 = pnand %p551_p0, %p539_p3  ;;  %p559_p12 = scmp.lt.s32.totalorder %s557_s25, %s550_s17 }
  0x26   : > { %p554_p4 = pneg %p553_p2  ;;  %p560_p11 = por %p559_p12, %p558_p1 }
  0x28   : > { %p561_p5 = pnand %p560_p11, %p554_p4 }
  0x2a   : > { %564 = shalt.err (!%p561_p5)
}
  0x2b   : > { %482 = dma.hbm_to_vmem [thread:$0]  (!%p754_p13), %s750_s28, 128, %s758_s30, %s118_s4  }
  0x2c   : > { %p919_p9 = scmp.lt.s32.totalorder %s661_s12, 3  ;;  %p920_p0 = scmp.ge.s32.totalorder %s661_s12, 1 }
  0x2d   : > { %s457_s27 = sshll.u32 %s743_s23, 5  ;;  %s472_s29 = sshll.u32 %s661_s12, 9 }
  0x2e   : > { %p791_p7 = pnand %p920_p0, %p919_p9  ;;  %s800_s7 = scalar_lea.hbm %s910_s1, %s472_s29 }
  0x2f   : > { %s139_s8 = scalar_lea.vmem [#allocation5], %s457_s27  ;;  %s136_s28 = scalar_lea.sflag [#allocation6], %s743_s23 }
  0x30   : > { %s146_s14 = sshll.u32 %s139_s8, 4  ;;  %s565_s30 = scalar_lea.hbm %s800_s7, 512  ;;  %s802_s14 = int_to_ptr.vmem [resolvable:$true] %s146_s14 }
  0x31   : > { %p566_p11 = scmp.ne.s32.totalorder %s800_s7, %s565_s30  ;;  %s570_s17 = scalar_lea.hbm %s910_s1, 1024 }
  0x32   : > { %p571_p8 = scmp.lt.s32.totalorder %s800_s7, %s910_s1  ;;  %p572_p10 = scmp.lt.s32.totalorder %s570_s17, %s565_s30 }
  0x33   : > { %p568_p12 = pnand %p566_p11, %p539_p3 }
  0x34   : > { %p573_p2 = por %p572_p10, %p571_p8 }
  0x35   : > { %p569_p1 = pneg %p568_p12 }
  0x37   : > { %p574_p4 = pnand %p573_p2, %p569_p1 }
  0x39   : > { %577 = shalt.err (!%p574_p4)
}
  0x3a   : > { %s578_s25 = scalar_lea.vmem %s802_s14, 512  ;;  %s664_s27 = smov [#allocation5]  }
  0x3b   : > { %p579_p5 = scmp.ne.s32.totalorder %s802_s14, %s578_s25  ;;  %s583_s29 = sshll.u32 %s664_s27, 4  ;;  %s584_s29 = int_to_ptr.vmem [resolvable:$false] %s583_s29 }
  0x3c   : > { %s585_s5 = scalar_lea.vmem %s584_s29, 1024  ;;  %p586_p11 = scmp.lt.s32.totalorder %s802_s14, %s584_s29 }
  0x3d   : > { %p581_p9 = pnand %p579_p5, %p539_p3  ;;  %p587_p12 = scmp.lt.s32.totalorder %s585_s5, %s578_s25 }
  0x3f   : > { %p582_p0 = pneg %p581_p9  ;;  %p588_p6 = por %p587_p12, %p586_p11 }
  0x41   : > { %p589_p8 = pnand %p588_p6, %p582_p0 }
  0x43   : > { %592 = shalt.err (!%p589_p8)
}
  0x44   : > { %s665_s6 = smov 128   ;;  %s666_s8 = smov 8  }
  0x45   : > { %485 = dma.hbm_to_vmem [thread:$0]  (!%p754_p13), %s800_s7, 512, %s802_s14, %s136_s28, %s665_s6, %s665_s6, %s666_s8  }
  0x46   : > { %158 = sbr.rel (%p791_p7) target bundleno = 314 (0x13a), region = 28  ;;  %s832_s30 = sand.u32 (!%p791_p7), 1, %s653_s10  }
  0x47   : > { %s461_s4 = sshll.u32 (!%p791_p7), %s832_s30, 3  ;;  %s161_s16 = scalar_lea.sflag (!%p791_p7), [#allocation3], %s832_s30 }
  0x48   : > { %s164_s17 = scalar_lea.vmem (!%p791_p7), [#allocation2], %s461_s4  ;;  %p922_p6 = scmp.ne.s32.totalorder (!%p791_p7), %s915_s20, 0 }
  0x4b   : > { %636 = dma.done.wait (%p922_p6), %s161_s16, 128  }
  0x4c   : > { %638 = vsyncadd (%p922_p6), %s161_s16, 4294967168  ;;  %s462_s23 = sshll.u32 %s832_s30, 5  ;;  %s170_s3 = scalar_lea.sflag [#allocation6], %s832_s30 }
  0x4d   : > { %s173_s26 = scalar_lea.vmem [#allocation5], %s462_s23 }
  0x4e   : > { %640 = dma.done.wait (%p922_p6), %s170_s3, 512  }
  0x4f   : > { %642 = vsyncadd (%p922_p6), %s170_s3, 4294966784  ;;  %v848_v0 = vld [vmem:[%s173_s26] sm:$0xff]  ;;  %v199_v1 = vld [vmem:[%s164_s17] sm:$0xff]  ;;  %v667_v3 = vmov 0.0   ;;  %s469_s20 = sshll.u32 %s705_s13, 7  ;;  %s198_s7 = scalar_lea.vmem [#allocation7], %s461_s4 }
  0x50   : > { %v850_v2 = vld [vmem:[%s173_s26 + $0x8] sm:$0xff]  ;;  %222 = vadd.xlane.f32.xlu1 %v848_v0  ;;  %vm200_vm0 = vcmp.gt.f32.partialorder %v199_v1, 0.5  ;;  %v853_v5 = vld [vmem:[%s173_s26 + $0x10] sm:$0xff]  ;;  %v857_v8 = vld [vmem:[%s173_s26 + $0x18] sm:$0xff]  ;;  %s359_s14 = sshll.u32 %s198_s7, 4  ;;  %s357_s24 = scalar_lea.hbm %s911_s2, %s469_s20  ;;  %s360_s14 = int_to_ptr.vmem [resolvable:$true] %s359_s14 }
  0x51   : > { %v464_v4 = vsel %vm200_vm0, 1.0, %v667_v3  ;;  %s346_s25 = scalar_lea.sflag [#allocation4], %s832_s30  ;;  %s593_s27 = scalar_lea.vmem %s360_s14, 128 }
  0x52   : > { %203 = vadd.xlane.f32.xlu0 %v464_v4  ;;  %v243_v6 = vmul.f32 %v850_v2, %v464_v4  ;;  %v271_v7 = vmul.f32 %v853_v5, %v464_v4  ;;  %v299_v9 = vmul.f32 %v857_v8, %v464_v4  ;;  %v213_v10 = vmul.f32 %v464_v4, %v848_v0  ;;  %p594_p13 = scmp.ne.s32.totalorder %s360_s14, %s593_s27  ;;  %p923_p3 = scmp.ne.s32.totalorder %s916_s21, 0 }
  0x53   : > { %s668_s29 = smov [#allocation7]  }
  0x54   : > { %244 = vadd.xlane.f32.xlu1 %v243_v6  ;;  %p595_p7 = pnand %p594_p13, %p923_p3  ;;  %s597_s5 = sshll.u32 %s668_s29, 4  ;;  %s598_s5 = int_to_ptr.vmem [resolvable:$false] %s597_s5 }
  0x55   : > { %s599_s13 = scalar_lea.vmem %s598_s5, 256  ;;  %p600_p10 = scmp.lt.s32.totalorder %s360_s14, %s598_s5 }
  0x56   : > { %252 = vadd.xlane.f32.xlu0 %v850_v2  ;;  %p596_p1 = pneg %p595_p7  ;;  %p601_p2 = scmp.lt.s32.totalorder %s599_s13, %s593_s27 }
  0x58   : > { %272 = vadd.xlane.f32.xlu1 %v271_v7  ;;  %p602_p4 = por %p601_p2, %p600_p10 }
  0x5a   : > { %280 = vadd.xlane.f32.xlu0 %v853_v5  ;;  %p603_p5 = pnand %p602_p4, %p596_p1 }
  0x5c   : > { %300 = vadd.xlane.f32.xlu1 %v299_v9 }
  0x5e   : > { %214 = vadd.xlane.f32.xlu0 %v213_v10 }
  0x62   : > { %308 = vadd.xlane.f32.xlu0 %v857_v8 }
  0xd9   : > { %v223_v11 = vpop.xlane.xlu1 %222 }
  0xda   : > { %v224_v17 = vrot.slane %v223_v11, 4 }
  0xdb   : > { %v204_v12 = vpop.xlane.xlu0 %203 }
  0xdc   : > { %v205_v13 = vrot.slane %v204_v12, 4  ;;  %v225_v25 = vadd.f32 %v224_v17, %v223_v11 }
  0xdd   : > { %v245_v14 = vpop.xlane.xlu1 %244 }
  0xde   : > { %v206_v15 = vadd.f32 %v205_v13, %v204_v12  ;;  %v246_v16 = vrot.slane %v245_v14, 4  ;;  %v226_v36 = vrot.slane %v225_v25, 2 }
  0xdf   : > { %v253_v18 = vpop.xlane.xlu0 %252 }
  0xe0   : > { %v207_v19 = vrot.slane %v206_v15, 2  ;;  %v254_v20 = vrot.slane %v253_v18, 4  ;;  %v247_v21 = vadd.f32 %v246_v16, %v245_v14  ;;  %v227_v51 = vadd.f32 %v226_v36, %v225_v25 }
  0xe1   : > { %v273_v22 = vpop.xlane.xlu1 %272 }
  0xe2   : > { %v208_v23 = vadd.f32 %v207_v19, %v206_v15  ;;  %v255_v24 = vadd.f32 %v254_v20, %v253_v18  ;;  %v274_v27 = vrot.slane %v273_v22, 4  ;;  %v248_v30 = vrot.slane %v247_v21, 2 }
  0xe3   : > { %v281_v26 = vpop.xlane.xlu0 %280  ;;  %v228_v61 = vrot.slane %v227_v51, 1 }
  0xe4   : > { %v209_v28 = vrot.slane %v208_v23, 1  ;;  %v256_v29 = vrot.slane %v255_v24, 2  ;;  %v282_v31 = vrot.slane %v281_v26, 4  ;;  %v275_v32 = vadd.f32 %v274_v27, %v273_v22 }
  0xe5   : > { %v301_v33 = vpop.xlane.xlu1 %300  ;;  %v249_v42 = vadd.f32 %v248_v30, %v247_v21  ;;  %v229_v14 = vadd.f32 %v228_v61, %v227_v51 }
  0xe6   : > { %v210_v34 = vadd.f32 %v209_v28, %v208_v23  ;;  %v302_v35 = vrot.slane %v301_v33, 4  ;;  %v283_v37 = vadd.f32 %v282_v31, %v281_v26  ;;  %v276_v38 = vrot.slane %v275_v32, 2 }
  0xe7   : > { %v215_v39 = vpop.xlane.xlu0 %214  ;;  %v257_v41 = vadd.f32 %v256_v29, %v255_v24  ;;  %v250_v53 = vrot.slane %v249_v42, 1 }
  0xe8   : > { %v211_v40 = vsub.f32 256.0, %v210_v34  ;;  %527 = vrcp.f32 %v210_v34  ;;  %v284_v43 = vrot.slane %v283_v37, 2  ;;  %v277_v44 = vadd.f32 %v276_v38, %v275_v32 }
  0xe9   : > { %v303_v45 = vadd.f32 %v302_v35, %v301_v33  ;;  %v216_v46 = vrot.slane %v215_v39, 4  ;;  %v258_v52 = vrot.slane %v257_v41, 1  ;;  %v251_v62 = vadd.f32 %v250_v53, %v249_v42 }
  0xea   : > { %529 = vrcp.f32 %v211_v40  ;;  %v285_v47 = vadd.f32 %v284_v43, %v283_v37  ;;  %v278_v56 = vrot.slane %v277_v44, 1 }
  0xeb   : > { %v304_v48 = vrot.slane %v303_v45, 2  ;;  %v217_v49 = vadd.f32 %v216_v46, %v215_v39  ;;  %v309_v50 = vpop.xlane.xlu0 %308  ;;  %v259_v3 = vadd.f32 %v258_v52, %v257_v41 }
  0xec   : > { %v310_v54 = vrot.slane %v309_v50, 4  ;;  %v286_v55 = vrot.slane %v285_v47, 1  ;;  %v279_v6 = vadd.f32 %v278_v56, %v277_v44 }
  0xed   : > { %v305_v57 = vadd.f32 %v304_v48, %v303_v45  ;;  %v218_v58 = vrot.slane %v217_v49, 2  ;;  %v261_v15 = vsub.f32 %v259_v3, %v251_v62 }
  0xee   : > { %v311_v59 = vadd.f32 %v310_v54, %v309_v50  ;;  %v287_v4 = vadd.f32 %v286_v55, %v285_v47 }
  0xef   : > { %v219_v60 = vadd.f32 %v218_v58, %v217_v49  ;;  %v306_v63 = vrot.slane %v305_v57, 1 }
  0xf0   : > { %v312_v1 = vrot.slane %v311_v59, 2  ;;  %v289_v16 = vsub.f32 %v287_v4, %v279_v6 }
  0xf1   : > { %v220_v7 = vrot.slane %v219_v60, 1  ;;  %v307_v11 = vadd.f32 %v306_v63, %v305_v57 }
  0xf2   : > { %v313_v9 = vadd.f32 %v312_v1, %v311_v59 }
  0xf3   : > { %v221_v10 = vadd.f32 %v220_v7, %v219_v60 }
  0xf4   : > { %v314_v12 = vrot.slane %v313_v9, 1 }
  0xf5   : > { %v528_v13 = vpop.eup %527  ;;  %v232_v22 = vsub.f32 %v229_v14, %v221_v10 }
  0xf6   : > { %v260_v17 = vmul.f32 %v528_v13, %v251_v62  ;;  %v288_v18 = vmul.f32 %v528_v13, %v279_v6  ;;  %v316_v19 = vmul.f32 %v528_v13, %v307_v11  ;;  %v231_v20 = vmul.f32 %v528_v13, %v221_v10 }
  0xf7   : > { %v530_v21 = vpop.eup %529  ;;  %v315_v23 = vadd.f32 %v314_v12, %v313_v9 }
  0xf8   : > { %v262_v24 = vmul.f32 %v530_v21, %v261_v15  ;;  %v263_v25 = vsub.f32 %v850_v2, %v260_v17  ;;  %v290_v26 = vmul.f32 %v530_v21, %v289_v16  ;;  %v291_v27 = vsub.f32 %v853_v5, %v288_v18 }
  0xf9   : > { %v234_v28 = vmul.f32 %v530_v21, %v232_v22  ;;  %v235_v29 = vsub.f32 %v848_v0, %v231_v20  ;;  %v317_v30 = vsub.f32 %v315_v23, %v307_v11  ;;  %v319_v33 = vsub.f32 %v857_v8, %v316_v19 }
  0xfa   : > { %v264_v31 = vsub.f32 %v850_v2, %v262_v24  ;;  %v265_v32 = vmul.f32 %v263_v25, %v263_v25  ;;  %v292_v34 = vsub.f32 %v853_v5, %v290_v26  ;;  %v293_v39 = vmul.f32 %v291_v27, %v291_v27 }
  0xfb   : > { %v236_v35 = vsub.f32 %v848_v0, %v234_v28  ;;  %v237_v36 = vmul.f32 %v235_v29, %v235_v29  ;;  %v318_v37 = vmul.f32 %v530_v21, %v317_v30  ;;  %v321_v44 = vmul.f32 %v319_v33, %v319_v33 }
  0xfc   : > { %v267_v38 = vmul.f32 %v264_v31, %v264_v31  ;;  %v295_v43 = vmul.f32 %v292_v34, %v292_v34 }
  0xfd   : > { %v239_v40 = vmul.f32 %v236_v35, %v236_v35  ;;  %v266_v41 = vadd.f32 %v265_v32, %v237_v36  ;;  %v320_v42 = vsub.f32 %v857_v8, %v318_v37 }
  0xff   : > { %v268_v45 = vadd.f32 %v267_v38, %v239_v40  ;;  %v294_v46 = vadd.f32 %v293_v39, %v266_v41  ;;  %v323_v48 = vmul.f32 %v320_v42, %v320_v42 }
 0x101   : > { %v322_v2 = vadd.f32 %v321_v44, %v294_v46  ;;  %v296_v47 = vadd.f32 %v295_v43, %v268_v45 }
 0x103   : > { %531 = vrsqrt.f32 %v322_v2  ;;  %v324_v49 = vadd.f32 %v323_v48, %v296_v47  ;;  %vm334_vm1 = vcmp.eq.f32.partialorder %v322_v2, inf  ;;  %v337_v53 = vand.u32 2147483648, %v322_v2 }
 0x104   : > { %vm336_vm4 = vcmp.eq.f32.partialorder %v322_v2, 0.0 }
 0x105   : > { %533 = vrsqrt.f32 %v324_v49  ;;  %vm327_vm2 = vcmp.eq.f32.partialorder %v324_v49, inf  ;;  %v330_v8 = vand.u32 2147483648, %v324_v49  ;;  %vm329_vm3 = vcmp.eq.f32.partialorder %v324_v49, 0.0 }
 0x110   : > { %v532_v5 = vpop.eup %531 }
 0x111   : > { %v333_v0 = vmul.f32 %v532_v5, %v322_v2 }
 0x112   : > { %v534_v50 = vpop.eup %533 }
 0x113   : > { %v326_v51 = vmul.f32 %v534_v50, %v324_v49  ;;  %v335_v52 = vsel %vm334_vm1, %v322_v2, %v333_v0 }
 0x114   : > { %v338_v56 = vsel %vm336_vm4, %v337_v53, %v335_v52 }
 0x115   : > { %v328_v54 = vsel %vm327_vm2, %v324_v49, %v326_v51 }
 0x116   : > { %v331_v55 = vsel %vm329_vm3, %v330_v8, %v328_v54 }
 0x117   : > { %v339_v57 = vsub.f32 %v331_v55, %v338_v56 }
 0x119   : > { %v340_v58 = vmul.f32 0.5, %v339_v57 }
 0x11b   : > { %535 = vtanh.f32 %v340_v58 }
 0x128   : > { %v536_v59 = vpop.eup %535 }
 0x129   : > { %v342_v60 = vadd.f32 1.0, %v536_v59 }
 0x12b   : > { %v343_v61 = vmul.f32 0.5, %v342_v60 }
 0x12d   : > { %344 = vst [vmem:[%s198_s7] sm:$0xff] %v343_v61 }
 0x12e   : > { %606 = shalt.err (!%p603_p5)
}
 0x12f   : > { %s607_s6 = scalar_lea.hbm %s357_s24, 128  ;;  %s611_s4 = scalar_lea.hbm %s911_s2, 256 }
 0x130   : > { %p608_p9 = scmp.ne.s32.totalorder %s357_s24, %s607_s6  ;;  %p612_p12 = scmp.lt.s32.totalorder %s357_s24, %s911_s2 }
 0x131   : > { %p613_p8 = scmp.lt.s32.totalorder %s611_s4, %s607_s6 }
 0x132   : > { %p609_p0 = pnand %p608_p9, %p923_p3 }
 0x133   : > { %p614_p6 = por %p613_p8, %p612_p12 }
 0x134   : > { %p610_p11 = pneg %p609_p0 }
 0x136   : > { %p615_p13 = pnand %p614_p6, %p610_p11 }
 0x138   : > { %618 = shalt.err (!%p615_p13)
}
 0x139   : > { %477 = dma.vmem_to_hbm [thread:$0]  (%p923_p3), %s360_s14, 128, %s357_s24, %s346_s25  }
 0x13a PF: > { %s371_s23 = sand.u32 1, %s649_s9   ;;  %p924_p7 = scmp.ne.s32.totalorder %s917_s22, 0 }
 0x13b   : > { %p925_p1 = scmp.ge.s32.totalorder %s661_s12, 2  ;;  %s372_s3 = scalar_lea.sflag [#allocation4], %s371_s23 }
 0x13d   : > { %p487_p10 = pnand %p925_p1, %p924_p7 }
 0x13f   : > { %p488_p2 = pneg %p487_p10 }
 0x141   : > { %644 = dma.done.wait (%p488_p2), %s372_s3, 128  }
 0x142   : > { %646 = vsyncadd (%p488_p2), %s372_s3, 4294967168  ;;  %p18_p4 = scmp.ge.s32.totalorder %s709_s15, 4   ;;  %s926_s9 = smov %s653_s10 }
 0x143   : > { %s927_s10 = smov %s657_s11  ;;  %s928_s11 = smov %s721_s18 }
 0x144   : > { %s929_s12 = smov %s709_s15  ;;  %20 = sbr.rel (!%p18_p4) target bundleno = 7 (0x7), region = 89 }
 0x149   :  { %377 = vsyncpa [#allocation3], 1 }
 0x14a   :  { %379 = vsyncpa [#allocation3 + $0x1], 1 }
 0x14b   :  { %380 = vsyncpa [#allocation6], 1 }
 0x14c   :  { %382 = vsyncpa [#allocation6 + $0x1], 1 }
 0x14d   :  { %383 = vsyncpa [#allocation4], 1 }
 0x14e   :  { %385 = vsyncpa [#allocation4 + $0x1], 1 }

</bundles_post_ra>
